<compile_context>
chip_gen: v5e
topology: v5e:2x2
jax: 0.10.0
libtpu: 0.0.40
codegen_flags: <defaults>
</compile_context>

<pallas_src>
import jax
import jax.numpy as jnp
from jax.experimental import pallas as pl
from jax.experimental.pallas import tpu as pltpu

_LANE = 128
_SUBLANE = 8
_TINY_ELEMS = 1 << 15                    # below this, skip Pallas in the module
_VMEM_TILE_BUDGET = 24 * 1024 * 1024     # bytes for all live tiles (in+out, 2x buffered)


def _identity_alias_kernel(x_hbm_ref, o_hbm_ref):
    # Output HBM buffer aliases the input (input_output_aliases={0: 0});
    # the data is already where it needs to be: no DMA, no compute.
    del x_hbm_ref, o_hbm_ref


def _identity_copy_kernel(x_ref, o_ref):
    # Plain VMEM tile copy (only used when an explicit materialized copy is
    # requested).  All wins live in BlockSpec/layout, not in this body.
    o_ref[...] = x_ref[...]


def _pick_lane_width(n):
    """Largest width w (multiple of 128) such that w divides n, else None."""
    for w in (32 * _LANE, 16 * _LANE, 8 * _LANE, 4 * _LANE, 2 * _LANE, _LANE):
        if n % w == 0:
            return w
    return None


def _identity_copy(x):
    """Explicit tiled copy: lane-dense layout, VMEM-capped sublane-aligned tiles."""
    orig_shape = x.shape
    n = int(x.size)
    itemsize = x.dtype.itemsize

    w = _pick_lane_width(n)
    if w is None:
        # No lane-dense factorization (tiny / odd element counts): copy the
        # whole flattened array as one full-extent block (always legal).
        x2 = x.reshape(1, n)
        out2 = pl.pallas_call(
            _identity_copy_kernel,
            out_shape=jax.ShapeDtypeStruct((1, n), x.dtype),
        )(x2)
        return out2.reshape(orig_shape)

    x2 = x.reshape(-1, w)                 # lane-dense: cols is a multiple of 128
    rows, cols = x2.shape

    # Sublane packing: 8 rows (32-bit), 16 (bf16/f16), 32 (int8/fp8).
    sublane = _SUBLANE * max(1, 4 // itemsize)

    # 2 arrays x 2 pipeline buffers = 4 live tiles; keep them under the budget
    # so the tile fits v7x's smaller VMEM as well as v5e/v6e.
    max_rows_by_vmem = max(sublane, _VMEM_TILE_BUDGET // (4 * cols * itemsize))

    tile_rows = min(rows, 1024, max_rows_by_vmem)
    tile_rows = max(sublane, (tile_rows // sublane) * sublane)
    if tile_rows >= rows:
        tile_rows = rows                  # full-extent block is always legal

    grid = (pl.cdiv(rows, tile_rows),)

    out2 = pl.pallas_call(
        _identity_copy_kernel,
        out_shape=jax.ShapeDtypeStruct((rows, cols), x.dtype),
        grid_spec=pltpu.PrefetchScalarGridSpec(
            num_scalar_prefetch=0,
            grid=grid,
            in_specs=[pl.BlockSpec((tile_rows, cols), lambda i: (i, 0))],
            out_specs=pl.BlockSpec((tile_rows, cols), lambda i: (i, 0)),
        ),
        compiler_params=pltpu.CompilerParams(
            # "parallel" lets v7x shard the row axis across its 2 TensorCores;
            # near-neutral on single-core v5e/v6e.
            dimension_semantics=("parallel",),
            vmem_limit_bytes=32 * 1024 * 1024,
        ),
    )(x2)
    return out2.reshape(orig_shape)


def identity_pallas(x, *, materialize=False):
    """Identity forward pass as a Pallas TPU kernel.

    Default: zero-copy -- the Pallas output aliases the input HBM buffer, so
    no data movement is generated.  ``materialize=True`` forces an explicit
    tiled copy into a fresh buffer.
    """
    if x.ndim == 0:
        # Scalars: nothing a kernel could improve on.
        return x
    if materialize:
        return _identity_copy(x)
    return pl.pallas_call(
        _identity_alias_kernel,
        out_shape=jax.ShapeDtypeStruct(x.shape, x.dtype),
        in_specs=[pl.BlockSpec(memory_space=pl.ANY)],
        out_specs=pl.BlockSpec(memory_space=pl.ANY),
        input_output_aliases={0: 0},
    )(x)


class IdentityPallas:
    """Mirror of the PyTorch Identity(latent_dim, n_classes) module."""

    def __init__(self, latent_dim, n_classes):
        # The PyTorch module's __init__ creates no parameters.
        self.latent_dim = latent_dim
        self.n_classes = n_classes

    def __call__(self, x):
        # Tiny inputs: kernel launch overhead >> any copy cost; identity needs
        # zero data movement, so skip Pallas entirely.
        if x.ndim == 0 or int(x.size) <= _TINY_ELEMS:
            return x
        return identity_pallas(x)


if __name__ == "__main__":
    key = jax.random.PRNGKey(0)
    latent_dim = 32
    n_classes = 4

    # Latent-classifier-shaped input: (batch=2, latent_dim=32).
    x = jax.random.normal(key, (2, latent_dim), dtype=jnp.float32)

    model = IdentityPallas(latent_dim, n_classes)
    y = jax.block_until_ready(model(x))
    assert y.shape == x.shape and y.dtype == x.dtype
    assert bool(jnp.all(y == x))

    # Explicitly exercise the zero-copy aliasing kernel.
    y_alias = jax.block_until_ready(identity_pallas(x))
    assert y_alias.shape == x.shape and y_alias.dtype == x.dtype
    assert bool(jnp.all(y_alias == x))

    # Exercise the explicit-copy kernel: fallback path (64 elements has no
    # 128-wide factorization -> single full-extent block) ...
    y_copy = jax.block_until_ready(identity_pallas(x, materialize=True))
    assert y_copy.shape == x.shape and y_copy.dtype == x.dtype
    assert bool(jnp.all(y_copy == x))

    # ... and the lane-dense tiled path on a small NCHW-style feature map
    # (2*4*16*16 = 2048 elements -> a (1, 2048) lane-dense slab).
    x4 = jax.random.normal(jax.random.PRNGKey(1), (2, 4, 16, 16),
                           dtype=jnp.float32)
    y4 = jax.block_until_ready(identity_pallas(x4, materialize=True))
    assert y4.shape == x4.shape and y4.dtype == x4.dtype
    assert bool(jnp.all(y4 == x4))

    print("KERNEL_OK")
</pallas_src>

<mosaic_0001>
module attributes {stable_mosaic.version = 11 : i64} {
  func.func @_identity_alias_kernel(%arg0: memref<2x32xf32, #tpu.memory_space<any>>, %arg1: memref<2x32xf32, #tpu.memory_space<any>>) attributes {dimension_semantics = [], scalar_prefetch = 0 : i64, scratch_operands = 0 : i64, tpu.core_type = #tpu.core_type<tc>} {
    return
  }
}

</mosaic_0001>

<bundles_post_ra>
// kernel: tpu_custom_call.1
= control target key start
LH: loop header
LB: loop body
LE: loop exit
PB: predicated region body
PF: predicated region fallthrough
CT: control target
= control target key end

     0   :  { %s16_s0 = inlined_call_operand.hbm [shape: f32[2,32], index: 0, kind: input, shape index: {}, may-alias: {0,1}]   ;;  %s17_s1 = inlined_call_operand.hbm [shape: f32[2,32], index: 1, kind: output, shape index: {}, may-alias: {0,1}]  }

</bundles_post_ra>
